<compile_context>
chip_gen: v7x
topology: tpu7x:2x2x1
jax: 0.10.0
libtpu: 0.0.40
codegen_flags: <defaults>
</compile_context>

<pallas_src>
import functools

import jax
import jax.numpy as jnp
from jax.experimental import pallas as pl
from jax.experimental.pallas import tpu as pltpu

LANE = 128
_NEG_BIG = -1e30  # "-inf"-safe pad for unused logit columns


def _round_up(x, m):
    return ((x + m - 1) // m) * m


def _vmem_budget_bytes():
    """Generation-aware usable-VMEM budget (leave ~20% headroom for Mosaic)."""
    try:
        cap = int(pltpu.get_tpu_info().vmem_capacity_bytes)
    except Exception:
        cap = 64 * 1024 * 1024  # conservative fallback (v7x per-TC VMEM)
    return int(cap * 0.8)


def _choose_tile_b(batch, dim_in, do_p, weight_bytes, vmem_budget):
    """Largest batch tile that fits the VMEM budget, multiple of 16 rows."""
    # x tile (f32, double-buffered) + out tile (f32, double-buffered), per row:
    per_row = dim_in * 4 * 2 + do_p * 4 * 2
    avail = vmem_budget - weight_bytes - (4 << 20)  # flat headroom for scratch
    tile_cap = max(16, (max(avail, 0) // per_row) // 16 * 16)
    tile_cap = min(tile_cap, 1024)
    tile_b = min(tile_cap, _round_up(batch, 16))
    # Prefer >= 2 grid steps (feeds v7x's 2nd TensorCore) when batch allows.
    if batch >= 32:
        while _round_up(batch, tile_b) // tile_b < 2 and tile_b > 16:
            tile_b = max(16, _round_up(tile_b // 2, 16))
    return tile_b


def _resident_spec(shape):
    """Grid-invariant (weight/bias) BlockSpec; single-buffered when supported."""
    try:
        return pl.BlockSpec(shape, lambda i: (0, 0), pipeline_mode=pl.Buffered(1))
    except TypeError:
        return pl.BlockSpec(shape, lambda i: (0, 0))


def mlp_kernel(x_ref, w1_ref, b1_ref, w2_ref, b2_ref, o_ref):
    # x_ref:  (TILE_B, dim_in)           f32  (cast to bf16 in-kernel)
    # w1_ref: (dim_in, dim_hidden)       bf16 (MXU-canonical (K, N))
    # b1_ref: (1, dim_hidden)            f32
    # w2_ref: (dim_hidden, do_p)         bf16 (columns padded to 128)
    # b2_ref: (1, do_p)                  f32  (padded entries = -1e30)
    # o_ref:  (TILE_B, do_p)             f32
    x = x_ref[...].astype(jnp.bfloat16)  # VPU cast; free under the memory bound

    # layer_input: x @ w1 + b1  (f32 accumulation on the MXU)
    h = jnp.dot(x, w1_ref[...], preferred_element_type=jnp.float32) + b1_ref[...]

    # dropout: identity in eval mode.
    # TODO(synk): training-mode nn.Dropout (Bernoulli mask + 1/(1-p) scale via
    # pltpu.prng_*) not reproduced; inference semantics (identity) used.

    # relu
    h = jnp.maximum(h, jnp.float32(0.0))

    # layer_hidden: h @ w2 + b2 (padded columns get -1e30 from b2)
    logits = jnp.dot(h.astype(jnp.bfloat16), w2_ref[...],
                     preferred_element_type=jnp.float32) + b2_ref[...]

    # softmax over the class axis; padded columns underflow to exactly 0.
    m = jnp.max(logits, axis=-1, keepdims=True)
    e = jnp.exp(logits - m)
    denom = jnp.sum(e, axis=-1, keepdims=True)
    o_ref[...] = (e / denom).astype(o_ref.dtype)  # exact normalization


def prepare_mlp_params(w1, b1, w2, b2):
    """One-time parameter prep (call ONCE, outside the jitted forward).

    PyTorch nn.Linear layouts in:  w1 (dim_hidden, dim_in), w2 (dim_out, dim_hidden).
    Returns MXU-canonical, lane-padded, bf16 weights + f32 row biases.
    """
    dim_out = w2.shape[0]
    do_p = _round_up(dim_out, LANE)
    w1_t = jnp.asarray(w1, jnp.float32).T.astype(jnp.bfloat16)           # (di, dh)
    b1_r = jnp.asarray(b1, jnp.float32)[None, :]                          # (1, dh)
    w2_t = jnp.pad(jnp.asarray(w2, jnp.float32).T,
                   ((0, 0), (0, do_p - dim_out))).astype(jnp.bfloat16)    # (dh, do_p)
    b2_r = jnp.pad(jnp.asarray(b2, jnp.float32), (0, do_p - dim_out),
                   constant_values=_NEG_BIG)[None, :]                      # (1, do_p)
    return w1_t, b1_r, w2_t, b2_r


@functools.partial(jax.jit, static_argnames=("dim_out",))
def mlp_forward(x_nchw, w1_t, b1_r, w2_t, b2_r, *, dim_out):
    """x_nchw: (B, C, H, W). Remaining args come from prepare_mlp_params."""
    B = x_nchw.shape[0]
    dim_in = x_nchw.shape[1] * x_nchw.shape[-2] * x_nchw.shape[-1]
    dim_hidden = w1_t.shape[1]
    do_p = w2_t.shape[1]

    # --- tiling from the per-generation VMEM budget -------------------------
    vmem_budget = _vmem_budget_bytes()
    weight_bytes = (w1_t.size * 2 + w2_t.size * 2 + b1_r.size * 4 + b2_r.size * 4)
    tile_b = _choose_tile_b(B, dim_in, do_p, weight_bytes, vmem_budget)
    b_p = _round_up(B, tile_b)
    grid_b = b_p // tile_b

    # Flatten exactly like torch's x.view(-1, C*H*W); pad batch; keep f32
    # (the bf16 cast happens inside the kernel, halving x's HBM traffic).
    x2d = x_nchw.reshape(B, dim_in)
    if b_p != B:
        x2d = jnp.pad(x2d, ((0, b_p - B), (0, 0)))

    grid_spec = pltpu.PrefetchScalarGridSpec(
        num_scalar_prefetch=0,
        grid=(grid_b,),
        in_specs=[
            pl.BlockSpec((tile_b, dim_in), lambda i: (i, 0)),  # x: tiled over B
            _resident_spec((dim_in, dim_hidden)),              # w1: VMEM-resident
            _resident_spec((1, dim_hidden)),                   # b1
            _resident_spec((dim_hidden, do_p)),                # w2
            _resident_spec((1, do_p)),                         # b2
        ],
        out_specs=pl.BlockSpec((tile_b, do_p), lambda i: (i, 0)),
    )

    cost = pl.CostEstimate(
        flops=2 * b_p * dim_in * dim_hidden + 2 * b_p * dim_hidden * do_p,
        transcendentals=b_p * do_p,
        bytes_accessed=(b_p * dim_in * 4 + w1_t.size * 2 + w2_t.size * 2
                        + b1_r.size * 4 + b2_r.size * 4 + b_p * do_p * 4),
    )

    out_padded = pl.pallas_call(
        mlp_kernel,
        out_shape=jax.ShapeDtypeStruct((b_p, do_p), jnp.float32),
        grid_spec=grid_spec,
        compiler_params=pltpu.CompilerParams(
            dimension_semantics=("parallel",),   # megacore-shard batch on v7x
            vmem_limit_bytes=vmem_budget,        # ~0.8 * per-generation VMEM
        ),
        cost_estimate=cost,
    )(x2d, w1_t, b1_r, w2_t, b2_r)

    # Strip batch / class padding.
    return out_padded[:B, :dim_out]


if __name__ == "__main__":
    key = jax.random.PRNGKey(0)
    kx, k1, k2, k3, k4 = jax.random.split(key, 5)

    # Small shapes: batch=2, channels=4, spatial=16x16 -> dim_in = 1024
    B, C, H, W = 2, 4, 16, 16
    dim_in = C * H * W
    dim_hidden = 32
    dim_out = 10

    x = jax.random.normal(kx, (B, C, H, W), dtype=jnp.float32)

    # Deterministic parameter init (PyTorch Linear-style uniform bounds).
    bound1 = 1.0 / (dim_in ** 0.5)
    w1 = jax.random.uniform(k1, (dim_hidden, dim_in), jnp.float32, -bound1, bound1)
    b1 = jax.random.uniform(k2, (dim_hidden,), jnp.float32, -bound1, bound1)
    bound2 = 1.0 / (dim_hidden ** 0.5)
    w2 = jax.random.uniform(k3, (dim_out, dim_hidden), jnp.float32, -bound2, bound2)
    b2 = jax.random.uniform(k4, (dim_out,), jnp.float32, -bound2, bound2)

    # One-time parameter preparation (hoisted out of the jitted forward).
    params = prepare_mlp_params(w1, b1, w2, b2)
    params = jax.block_until_ready(params)

    out = mlp_forward(x, *params, dim_out=dim_out)
    out = jax.block_until_ready(out)

    # Reference check in plain JAX f32 (same eval-mode semantics); bf16 matmul
    # operands introduce ~1e-3-level differences, well within tolerance.
    x2d = x.reshape(B, dim_in)
    h = jnp.maximum(x2d @ w1.T + b1, 0.0)
    ref = jax.nn.softmax(h @ w2.T + b2, axis=1)

    assert out.shape == (B, dim_out)
    assert jnp.allclose(jnp.sum(out, axis=1), 1.0, atol=1e-3)
    assert jnp.allclose(out, ref, atol=1e-2, rtol=1e-2)

    print("KERNEL_OK")
</pallas_src>

<mosaic_0001>
module attributes {stable_mosaic.version = 11 : i64} {
  func.func @mlp_kernel(%arg0: i32, %arg1: memref<16x1024xf32, #tpu.memory_space<vmem>>, %arg2: memref<1024x32xbf16, #tpu.memory_space<vmem>>, %arg3: memref<1x32xf32, #tpu.memory_space<vmem>>, %arg4: memref<32x128xbf16, #tpu.memory_space<vmem>>, %arg5: memref<1x128xf32, #tpu.memory_space<vmem>>, %arg6: memref<16x128xf32, #tpu.memory_space<vmem>>) attributes {dimension_semantics = [#tpu.dimension_semantics<parallel>], iteration_bounds = array<i64: 1>, scalar_prefetch = 0 : i64, scratch_operands = 0 : i64, tpu.core_type = #tpu.core_type<tc>, window_params = [{transform_indices = @transform_0, window_bounds = array<i64: 16, 1024>}, {pipeline_mode = #tpu.pipeline_mode<synchronous>, transform_indices = @transform_1, window_bounds = array<i64: 1024, 32>}, {pipeline_mode = #tpu.pipeline_mode<synchronous>, transform_indices = @transform_2, window_bounds = array<i64: 1, 32>}, {pipeline_mode = #tpu.pipeline_mode<synchronous>, transform_indices = @transform_3, window_bounds = array<i64: 32, 128>}, {pipeline_mode = #tpu.pipeline_mode<synchronous>, transform_indices = @transform_4, window_bounds = array<i64: 1, 128>}, {transform_indices = @transform_5, window_bounds = array<i64: 16, 128>}]} {
    %c0 = arith.constant 0 : index
    %c0_0 = arith.constant 0 : index
    %0 = vector.load %arg1[%c0, %c0_0] : memref<16x1024xf32, #tpu.memory_space<vmem>>, vector<16x1024xf32>
    %1 = arith.truncf %0 : vector<16x1024xf32> to vector<16x1024xbf16>
    %c0_1 = arith.constant 0 : index
    %c0_2 = arith.constant 0 : index
    %2 = vector.load %arg2[%c0_1, %c0_2] : memref<1024x32xbf16, #tpu.memory_space<vmem>>, vector<1024x32xbf16>
    %cst = arith.constant dense<0.000000e+00> : vector<16x32xf32>
    %3 = tpu.matmul %1, %2, %cst {dimension_numbers = #tpu.dot_dimension_numbers<[1], [0], [0], [1], [0, 0, 1, 1], [], []>} : vector<16x1024xbf16>, vector<1024x32xbf16>, vector<16x32xf32> -> vector<16x32xf32>
    %c0_3 = arith.constant 0 : index
    %c0_4 = arith.constant 0 : index
    %4 = vector.load %arg3[%c0_3, %c0_4] : memref<1x32xf32, #tpu.memory_space<vmem>>, vector<1x32xf32>
    %5 = vector.broadcast %4 : vector<1x32xf32> to vector<16x32xf32>
    %6 = arith.addf %3, %5 : vector<16x32xf32>
    %cst_5 = arith.constant 0.000000e+00 : f32
    %7 = vector.broadcast %cst_5 : f32 to vector<16x32xf32>
    %8 = arith.maximumf %6, %7 : vector<16x32xf32>
    %9 = arith.truncf %8 : vector<16x32xf32> to vector<16x32xbf16>
    %c0_6 = arith.constant 0 : index
    %c0_7 = arith.constant 0 : index
    %10 = vector.load %arg4[%c0_6, %c0_7] : memref<32x128xbf16, #tpu.memory_space<vmem>>, vector<32x128xbf16>
    %cst_8 = arith.constant dense<0.000000e+00> : vector<16x128xf32>
    %11 = tpu.matmul %9, %10, %cst_8 {dimension_numbers = #tpu.dot_dimension_numbers<[1], [0], [0], [1], [0, 0, 1, 1], [], []>} : vector<16x32xbf16>, vector<32x128xbf16>, vector<16x128xf32> -> vector<16x128xf32>
    %c0_9 = arith.constant 0 : index
    %c0_10 = arith.constant 0 : index
    %12 = vector.load %arg5[%c0_9, %c0_10] : memref<1x128xf32, #tpu.memory_space<vmem>>, vector<1x128xf32>
    %13 = vector.broadcast %12 : vector<1x128xf32> to vector<16x128xf32>
    %14 = arith.addf %11, %13 : vector<16x128xf32>
    %cst_11 = arith.constant dense<0xFF800000> : vector<16xf32>
    %15 = vector.multi_reduction <maximumf>, %14, %cst_11 [1] : vector<16x128xf32> to vector<16xf32>
    %16 = vector.shape_cast %15 : vector<16xf32> to vector<16x1xf32>
    %17 = vector.broadcast %16 : vector<16x1xf32> to vector<16x128xf32>
    %18 = arith.subf %14, %17 : vector<16x128xf32>
    %19 = math.exp %18 : vector<16x128xf32>
    %cst_12 = arith.constant dense<0.000000e+00> : vector<16xf32>
    %20 = vector.multi_reduction <add>, %19, %cst_12 [1] : vector<16x128xf32> to vector<16xf32>
    %21 = vector.shape_cast %20 : vector<16xf32> to vector<16x1xf32>
    %22 = vector.broadcast %21 : vector<16x1xf32> to vector<16x128xf32>
    %23 = arith.divf %19, %22 : vector<16x128xf32>
    %c0_13 = arith.constant 0 : index
    %c0_14 = arith.constant 0 : index
    %24 = vector.load %arg6[%c0_13, %c0_14] : memref<16x128xf32, #tpu.memory_space<vmem>>, vector<16x128xf32>
    tpu.vector_store %arg6[%c0_13, %c0_14], %23 {strides = array<i32>} : memref<16x128xf32, #tpu.memory_space<vmem>>, vector<16x128xf32>,
    return
  }
  func.func @transform_0(%arg0: i32) -> (i32, i32) {
    %c0_i32 = arith.constant 0 : i32
    %c0_i32_0 = arith.constant 0 : i32
    return %arg0, %c0_i32 : i32, i32
  }
  func.func @transform_1(%arg0: i32) -> (i32, i32) {
    %c0_i32 = arith.constant 0 : i32
    %c0_i32_0 = arith.constant 0 : i32
    %c0_i32_1 = arith.constant 0 : i32
    return %c0_i32, %c0_i32_0 : i32, i32
  }
  func.func @transform_2(%arg0: i32) -> (i32, i32) {
    %c0_i32 = arith.constant 0 : i32
    %c0_i32_0 = arith.constant 0 : i32
    %c0_i32_1 = arith.constant 0 : i32
    return %c0_i32, %c0_i32_0 : i32, i32
  }
  func.func @transform_3(%arg0: i32) -> (i32, i32) {
    %c0_i32 = arith.constant 0 : i32
    %c0_i32_0 = arith.constant 0 : i32
    %c0_i32_1 = arith.constant 0 : i32
    return %c0_i32, %c0_i32_0 : i32, i32
  }
  func.func @transform_4(%arg0: i32) -> (i32, i32) {
    %c0_i32 = arith.constant 0 : i32
    %c0_i32_0 = arith.constant 0 : i32
    %c0_i32_1 = arith.constant 0 : i32
    return %c0_i32, %c0_i32_0 : i32, i32
  }
  func.func @transform_5(%arg0: i32) -> (i32, i32) {
    %c0_i32 = arith.constant 0 : i32
    %c0_i32_0 = arith.constant 0 : i32
    return %arg0, %c0_i32 : i32, i32
  }
}

</mosaic_0001>

<bundles_post_ra>
// kernel: mlp_forward.1
= control target key start
LH: loop header
LB: loop body
LE: loop exit
PB: predicated region body
PF: predicated region fallthrough
CT: control target
= control target key end

     0   :  { %vm1068_vm0 = vmmov 0   ;;  %vm754_vm1 = vcmask 261120   ;;  %s1357_s1 = inlined_call_operand.vmem [shape: bf16[1024,32], index: 1, kind: input, shape index: {}]   ;;  %s1358_s0 = inlined_call_operand.vmem [shape: f32[16,1024], index: 0, kind: input, shape index: {}]   ;;  %s1359_s3 = inlined_call_operand.vmem [shape: bf16[32,128], index: 3, kind: input, shape index: {}]   ;;  %s1360_s2 = inlined_call_operand.vmem [shape: f32[1,32], index: 2, kind: input, shape index: {}]   ;;  %s1361_s4 = inlined_call_operand.vmem [shape: f32[1,128], index: 4, kind: input, shape index: {}]   ;;  %s1362_s5 = inlined_call_operand.vmem [shape: f32[16,128], index: 5, kind: output, shape index: {}]  }
   0x1   :  { %v993_v0 = vld [vmem:[%s1357_s1 + $0x40] sm:$0xff]   ;;  %v997_v4 = vld [vmem:[%s1357_s1 + $0x48] sm:$0xff]   ;;  %v1001_v8 = vld [vmem:[%s1357_s1 + $0x50] sm:$0xff]  }
   0x2   :  { %v994_v1 = vld [vmem:[%s1357_s1 + $0xc0] sm:$0xff]   ;;  %892 = vmatprep.subr.bf16.mxu0 %v993_v0  ;;  %v998_v5 = vld [vmem:[%s1357_s1 + $0xc8] sm:$0xff]   ;;  %v1002_v9 = vld [vmem:[%s1357_s1 + $0xd0] sm:$0xff]  }
   0x3   :  { %v995_v2 = vld [vmem:[%s1357_s1] sm:$0xff]   ;;  %914 = vmatprep.subr.bf16.mxu1 %v994_v1  ;;  %v999_v6 = vld [vmem:[%s1357_s1 + $0x8] sm:$0xff]   ;;  %v1003_v10 = vld [vmem:[%s1357_s1 + $0x10] sm:$0xff]  }
   0x4   :  { %v996_v3 = vld [vmem:[%s1357_s1 + $0x80] sm:$0xff]   ;;  %893 = vmatpush3.bf16.msra.mxu0 %v995_v2  ;;  %v1000_v7 = vld [vmem:[%s1357_s1 + $0x88] sm:$0xff]   ;;  %v1004_v11 = vld [vmem:[%s1357_s1 + $0x90] sm:$0xff]  }
   0x5   :  { %915 = vmatpush3.bf16.msra.mxu1 %v996_v3  ;;  %894 = vmatprep.subr.bf16.mxu0 %v997_v4  ;;  %v1005_v12 = vld [vmem:[%s1357_s1 + $0x58] sm:$0xff]   ;;  %v1009_v16 = vld [vmem:[%s1357_s1 + $0x60] sm:$0xff]   ;;  %v1013_v20 = vld [vmem:[%s1357_s1 + $0x68] sm:$0xff]  }
   0x6   :  { %916 = vmatprep.subr.bf16.mxu1 %v998_v5  ;;  %v1006_v13 = vld [vmem:[%s1357_s1 + $0xd8] sm:$0xff]   ;;  %v1010_v17 = vld [vmem:[%s1357_s1 + $0xe0] sm:$0xff]   ;;  %v1014_v21 = vld [vmem:[%s1357_s1 + $0xe8] sm:$0xff]  }
   0x7   :  { %v1007_v14 = vld [vmem:[%s1357_s1 + $0x18] sm:$0xff]   ;;  %v1011_v18 = vld [vmem:[%s1357_s1 + $0x20] sm:$0xff]   ;;  %v1015_v22 = vld [vmem:[%s1357_s1 + $0x28] sm:$0xff]  }
   0x8   :  { %895 = vmatpush3.bf16.msra.mxu0 %v999_v6  ;;  %v1008_v15 = vld [vmem:[%s1357_s1 + $0x98] sm:$0xff]   ;;  %v1012_v19 = vld [vmem:[%s1357_s1 + $0xa0] sm:$0xff]   ;;  %v1016_v23 = vld [vmem:[%s1357_s1 + $0xa8] sm:$0xff]  }
   0x9   :  { %917 = vmatpush3.bf16.msra.mxu1 %v1000_v7  ;;  %896 = vmatprep.subr.bf16.mxu0 %v1001_v8  ;;  %v1017_v24 = vld [vmem:[%s1357_s1 + $0x70] sm:$0xff]   ;;  %v1021_v28 = vld [vmem:[%s1357_s1 + $0x78] sm:$0xff]   ;;  %v22_v32 = vld [vmem:[%s1358_s0 + $0x8] sm:$0xff] }
   0xa   :  { %918 = vmatprep.subr.bf16.mxu1 %v1002_v9  ;;  %v1018_v25 = vld [vmem:[%s1357_s1 + $0xf0] sm:$0xff]   ;;  %v1022_v29 = vld [vmem:[%s1357_s1 + $0xf8] sm:$0xff]   ;;  %v30_v33 = vld [vmem:[%s1358_s0 + $0x48] sm:$0xff] }
   0xb   :  { %v1019_v26 = vld [vmem:[%s1357_s1 + $0x30] sm:$0xff]   ;;  %v1023_v30 = vld [vmem:[%s1357_s1 + $0x38] sm:$0xff]   ;;  %v38_v35 = vpack.c.bf16 %v30_v33, %v22_v32  ;;  %v21_v37 = vld [vmem:[%s1358_s0] sm:$0xff] }
   0xc   :  { %897 = vmatpush3.bf16.msra.mxu0 %v1003_v10  ;;  %v1020_v27 = vld [vmem:[%s1357_s1 + $0xb0] sm:$0xff]   ;;  %v1024_v31 = vld [vmem:[%s1357_s1 + $0xb8] sm:$0xff]   ;;  %v29_v38 = vld [vmem:[%s1358_s0 + $0x40] sm:$0xff] }
   0xd   :  { %919 = vmatpush3.bf16.msra.mxu1 %v1004_v11  ;;  %898 = vmatprep.subr.bf16.mxu0 %v1005_v12  ;;  %v24_v34 = vld [vmem:[%s1358_s0 + $0x18] sm:$0xff]  ;;  %v37_v40 = vpack.c.bf16 %v29_v38, %v21_v37  ;;  %v23_v41 = vld [vmem:[%s1358_s0 + $0x10] sm:$0xff]  ;;  %v1025_v44 = vld [vmem:[%s1357_s1 + $0x140] sm:$0xff]  }
   0xe   :  { %920 = vmatprep.subr.bf16.mxu1 %v1006_v13  ;;  %v32_v36 = vld [vmem:[%s1358_s0 + $0x58] sm:$0xff]  ;;  %v31_v42 = vld [vmem:[%s1358_s0 + $0x50] sm:$0xff]  ;;  %596 = vmatprep.mubr.bf16.mxu0 %v38_v35  ;;  %v1026_v45 = vld [vmem:[%s1357_s1 + $0x1c0] sm:$0xff]  }
   0xf   :  { %v40_v39 = vpack.c.bf16 %v32_v36, %v24_v34  ;;  %v39_v43 = vpack.c.bf16 %v31_v42, %v23_v41  ;;  %v1027_v46 = vld [vmem:[%s1357_s1 + $0x100] sm:$0xff]   ;;  %v1029_v48 = vld [vmem:[%s1357_s1 + $0x148] sm:$0xff]   ;;  %v1033_v52 = vld [vmem:[%s1357_s1 + $0x150] sm:$0xff]  }
  0x10   :  { %899 = vmatpush3.bf16.msra.mxu0 %v1007_v14  ;;  %v1028_v47 = vld [vmem:[%s1357_s1 + $0x180] sm:$0xff]   ;;  %v1030_v49 = vld [vmem:[%s1357_s1 + $0x1c8] sm:$0xff]   ;;  %v1034_v53 = vld [vmem:[%s1357_s1 + $0x1d0] sm:$0xff]  }
  0x11   :  { %921 = vmatpush3.bf16.msra.mxu1 %v1008_v15  ;;  %900 = vmatprep.subr.bf16.mxu0 %v1009_v16  ;;  %v1031_v50 = vld [vmem:[%s1357_s1 + $0x108] sm:$0xff]   ;;  %v1035_v54 = vld [vmem:[%s1357_s1 + $0x110] sm:$0xff]   ;;  %v1037_v56 = vld [vmem:[%s1357_s1 + $0x158] sm:$0xff]  }
  0x12   :  { %922 = vmatprep.subr.bf16.mxu1 %v1010_v17  ;;  %637 = vmatprep.mubr.bf16.mxu1 %v40_v39  ;;  %v1032_v51 = vld [vmem:[%s1357_s1 + $0x188] sm:$0xff]   ;;  %v1036_v55 = vld [vmem:[%s1357_s1 + $0x190] sm:$0xff]   ;;  %v1038_v57 = vld [vmem:[%s1357_s1 + $0x1d8] sm:$0xff]  }
  0x13   :  { %v1039_v58 = vld [vmem:[%s1357_s1 + $0x118] sm:$0xff]   ;;  %v1041_v60 = vld [vmem:[%s1357_s1 + $0x160] sm:$0xff]   ;;  %v1045_v0 = vld [vmem:[%s1357_s1 + $0x168] sm:$0xff]  }
  0x14   :  { %901 = vmatpush3.bf16.msra.mxu0 %v1011_v18  ;;  %v1040_v59 = vld [vmem:[%s1357_s1 + $0x198] sm:$0xff]   ;;  %v1042_v61 = vld [vmem:[%s1357_s1 + $0x1e0] sm:$0xff]   ;;  %v1046_v1 = vld [vmem:[%s1357_s1 + $0x1e8] sm:$0xff]  }
  0x15   :  { %923 = vmatpush3.bf16.msra.mxu1 %v1012_v19  ;;  %902 = vmatprep.subr.bf16.mxu0 %v1013_v20  ;;  %v1043_v62 = vld [vmem:[%s1357_s1 + $0x120] sm:$0xff]   ;;  %v1047_v2 = vld [vmem:[%s1357_s1 + $0x128] sm:$0xff]   ;;  %v1049_v4 = vld [vmem:[%s1357_s1 + $0x170] sm:$0xff]  }
  0x16   :  { %924 = vmatprep.subr.bf16.mxu1 %v1014_v21  ;;  %v1044_v63 = vld [vmem:[%s1357_s1 + $0x1a0] sm:$0xff]   ;;  %v1048_v3 = vld [vmem:[%s1357_s1 + $0x1a8] sm:$0xff]   ;;  %v1050_v5 = vld [vmem:[%s1357_s1 + $0x1f0] sm:$0xff]  }
  0x17   :  { %v1051_v6 = vld [vmem:[%s1357_s1 + $0x130] sm:$0xff]   ;;  %v1053_v8 = vld [vmem:[%s1357_s1 + $0x178] sm:$0xff]   ;;  %v26_v12 = vld [vmem:[%s1358_s0 + $0x28] sm:$0xff] }
  0x18   :  { %903 = vmatpush3.bf16.msra.mxu0 %v1015_v22  ;;  %v1052_v7 = vld [vmem:[%s1357_s1 + $0x1b0] sm:$0xff]   ;;  %v1054_v9 = vld [vmem:[%s1357_s1 + $0x1f8] sm:$0xff]   ;;  %v34_v13 = vld [vmem:[%s1358_s0 + $0x68] sm:$0xff] }
  0x19   :  { %925 = vmatpush3.bf16.msra.mxu1 %v1016_v23  ;;  %904 = vmatprep.subr.bf16.mxu0 %v1017_v24  ;;  %v1055_v10 = vld [vmem:[%s1357_s1 + $0x138] sm:$0xff]   ;;  %v42_v16 = vpack.c.bf16 %v34_v13, %v26_v12  ;;  %v25_v18 = vld [vmem:[%s1358_s0 + $0x20] sm:$0xff]  ;;  %v27_v20 = vld [vmem:[%s1358_s0 + $0x30] sm:$0xff] }
  0x1a   :  { %926 = vmatprep.subr.bf16.mxu1 %v1018_v25  ;;  %v1056_v11 = vld [vmem:[%s1357_s1 + $0x1b8] sm:$0xff]   ;;  %v33_v19 = vld [vmem:[%s1358_s0 + $0x60] sm:$0xff]  ;;  %v35_v22 = vld [vmem:[%s1358_s0 + $0x70] sm:$0xff]  ;;  %v1067_v25 = vmov 0.0  }
  0x1b   :  { %v28_v14 = vld [vmem:[%s1358_s0 + $0x38] sm:$0xff]  ;;  %v41_v21 = vpack.c.bf16 %v33_v19, %v25_v18  ;;  %v43_v23 = vpack.c.bf16 %v35_v22, %v27_v20  ;;  %v1057_v24 = vld [vmem:[%s1359_s3] sm:$0xff]  }
  0x1c   :  { %905 = vmatpush3.bf16.msra.mxu0 %v1019_v26  ;;  %v36_v15 = vld [vmem:[%s1358_s0 + $0x78] sm:$0xff]  ;;  %v1058_v26 = vld [vmem:[%s1359_s3 + $0x8] sm:$0xff]  }
  0x1d   :  { %927 = vmatpush3.bf16.msra.mxu1 %v1020_v27  ;;  %906 = vmatprep.subr.bf16.mxu0 %v1021_v28  ;;  %v44_v17 = vpack.c.bf16 %v36_v15, %v28_v14 }
  0x1e   :  { %928 = vmatprep.subr.bf16.mxu1 %v1022_v29  ;;  %v823_v29 = vld [vmem:[%s1360_s2] ss:$0 sm:$0xff] }
  0x20   :  { %907 = vmatpush3.bf16.msra.mxu0 %v1023_v30 }
  0x21   :  { %929 = vmatpush3.bf16.msra.mxu1 %v1024_v31  ;;  %936 = vmatprep.subr.bf16.mxu0 %v1025_v44 }
  0x22   :  { %958 = vmatprep.subr.bf16.mxu1 %v1026_v45 }
  0x23   :  { %597 = vmatmul.mubr.bf16.vlgmr.msra.gmra.mrb[0].mxu0 %v37_v40 }
  0x24   :  { %638 = vmatmul.mubr.bf16.vlgmr.msra.gmra.mrb[0].mxu1 %v39_v43  ;;  %937 = vmatpush3.bf16.msra.mxu0 %v1027_v46 }
  0x25   :  { %959 = vmatpush3.bf16.msra.mxu1 %v1028_v47  ;;  %938 = vmatprep.subr.bf16.mxu0 %v1029_v48 }
  0x26   :  { %960 = vmatprep.subr.bf16.mxu1 %v1030_v49  ;;  %678 = vmatprep.mubr.bf16.mxu0 %v42_v16 }
  0x27   :  { %719 = vmatprep.mubr.bf16.mxu1 %v44_v17 }
  0x28   :  { %939 = vmatpush3.bf16.msra.mxu0 %v1031_v50 }
  0x29   :  { %961 = vmatpush3.bf16.msra.mxu1 %v1032_v51  ;;  %940 = vmatprep.subr.bf16.mxu0 %v1033_v52 }
  0x2a   :  { %962 = vmatprep.subr.bf16.mxu1 %v1034_v53 }
  0x2c   :  { %941 = vmatpush3.bf16.msra.mxu0 %v1035_v54 }
  0x2d   :  { %963 = vmatpush3.bf16.msra.mxu1 %v1036_v55  ;;  %942 = vmatprep.subr.bf16.mxu0 %v1037_v56 }
  0x2e   :  { %964 = vmatprep.subr.bf16.mxu1 %v1038_v57 }
  0x30   :  { %943 = vmatpush3.bf16.msra.mxu0 %v1039_v58 }
  0x31   :  { %965 = vmatpush3.bf16.msra.mxu1 %v1040_v59  ;;  %944 = vmatprep.subr.bf16.mxu0 %v1041_v60 }
  0x32   :  { %966 = vmatprep.subr.bf16.mxu1 %v1042_v61 }
  0x34   :  { %945 = vmatpush3.bf16.msra.mxu0 %v1043_v62 }
  0x35   :  { %967 = vmatpush3.bf16.msra.mxu1 %v1044_v63  ;;  %946 = vmatprep.subr.bf16.mxu0 %v1045_v0  ;;  %v888_v63 = vld [vmem:[%s1361_s4] ss:$0 sm:$0xff] }
  0x36   :  { %968 = vmatprep.subr.bf16.mxu1 %v1046_v1 }
  0x38   :  { %947 = vmatpush3.bf16.msra.mxu0 %v1047_v2 }
  0x39   :  { %969 = vmatpush3.bf16.msra.mxu1 %v1048_v3  ;;  %948 = vmatprep.subr.bf16.mxu0 %v1049_v4 }
  0x3a   :  { %970 = vmatprep.subr.bf16.mxu1 %v1050_v5 }
  0x3c   :  { %949 = vmatpush3.bf16.msra.mxu0 %v1051_v6 }
  0x3d   :  { %971 = vmatpush3.bf16.msra.mxu1 %v1052_v7  ;;  %950 = vmatprep.subr.bf16.mxu0 %v1053_v8 }
  0x3e   :  { %972 = vmatprep.subr.bf16.mxu1 %v1054_v9 }
  0x40   :  { %951 = vmatpush3.bf16.msra.mxu0 %v1055_v10 }
  0x41   :  { %973 = vmatpush3.bf16.msra.mxu1 %v1056_v11  ;;  %983 = vmatprep.subr.bf16.mxu0 %v1067_v25 }
  0x43   :  { %679 = vmatmul.mubr.bf16.vlgmr.msra.gmra.mrb[4].mxu0 %v41_v21 }
  0x44   :  { %720 = vmatmul.mubr.bf16.vlgmr.msra.gmra.mrb[4].mxu1 %v43_v23  ;;  %984 = vmatpush3.bf16.msra.mxu0 %v1057_v24 }
  0x45   :  { %985 = vmatprep.subr.bf16.mxu0 %v1067_v25  ;;  %987 = vmatprep.mubr.msk.bf16.mxu0 %vm1068_vm0, %v1067_v25 }
  0x48   :  { %986 = vmatpush3.bf16.msra.mxu0 %v1058_v26 }
  0xf6   :  { %v908_v27 = vpop.f32.mrb[0].mxu0 }
  0xf7   :  { %v930_v28 = vpop.f32.mrb[0].mxu1  ;;  %v909_v30 = vpop.f32.mrb[1].mxu0 }
  0xf8   :  { %v910_v31 = vadd.f32 %v909_v30, %v908_v27  ;;  %v931_v32 = vpop.f32.mrb[1].mxu1  ;;  %v911_v33 = vpop.f32.mrb[2].mxu0 }
  0xf9   :  { %v932_v34 = vadd.f32 %v931_v32, %v930_v28  ;;  %v933_v35 = vpop.f32.mrb[2].mxu1  ;;  %v912_v36 = vpop.f32.mrb[3].mxu0 }
  0xfa   :  { %v599_v37 = vadd.f32 %v910_v31, %v823_v29  ;;  %v913_v38 = vadd.f32 %v912_v36, %v911_v33  ;;  %v934_v39 = vpop.f32.mrb[3].mxu1 }
  0xfb   :  { %v935_v40 = vadd.f32 %v934_v39, %v933_v35 }
  0xfc   :  { %v640_v41 = vadd.f32 %v932_v34, %v599_v37  ;;  %v602_v42 = vadd.f32 %v913_v38, %v823_v29 }
  0xfe   :  { %v643_v43 = vadd.f32 %v935_v40, %v602_v42 }
 0x116   :  { %v952_v44 = vpop.f32.mrb[4].mxu0 }
 0x117   :  { %v974_v45 = vpop.f32.mrb[4].mxu1  ;;  %v953_v46 = vpop.f32.mrb[5].mxu0 }
 0x118   :  { %v954_v47 = vadd.f32 %v953_v46, %v952_v44  ;;  %v975_v48 = vpop.f32.mrb[5].mxu1  ;;  %v955_v49 = vpop.f32.mrb[6].mxu0 }
 0x119   :  { %v976_v50 = vadd.f32 %v975_v48, %v974_v45  ;;  %v977_v51 = vpop.f32.mrb[6].mxu1  ;;  %v956_v52 = vpop.f32.mrb[7].mxu0 }
 0x11a   :  { %v681_v53 = vadd.f32 %v954_v47, %v640_v41  ;;  %v957_v54 = vadd.f32 %v956_v52, %v955_v49  ;;  %v978_v55 = vpop.f32.mrb[7].mxu1 }
 0x11b   :  { %v979_v56 = vadd.f32 %v978_v55, %v977_v51 }
 0x11c   :  { %v722_v57 = vadd.f32 %v976_v50, %v681_v53  ;;  %v684_v58 = vadd.f32 %v957_v54, %v643_v43 }
 0x11e   :  { %v725_v59 = vadd.f32 %v979_v56, %v684_v58  ;;  %v728_v60 = vmax.f32 %v722_v57, 0.0 }
 0x120   :  { %v729_v61 = vmax.f32 %v725_v59, 0.0 }
 0x122   :  { %v730_v62 = vpack.c.bf16 %v729_v61, %v728_v60 }
 0x124   :  { %988 = vmatmul.mubr.msk.bf16.vlgmr.msra.gmra.mrb[8].mxu0 %vm754_vm1, %v730_v62 }
 0x1f7   :  { %v792_v0 = vpop.f32.mrb[8].mxu0 }
 0x1f8   :  { %v793_v1 = vadd.f32 %v888_v63, %v792_v0  ;;  %v989_v2 = vpop.f32.mrb[9].mxu0 }
 0x1f9   :  { %v795_v3 = vpop.f32.mrb[10].mxu0 }
 0x1fa   :  { %799 = vmax.xlane.f32.xlu0 %v793_v1  ;;  %v990_v4 = vpop.f32.mrb[11].mxu0  ;;  %v796_v5 = vadd.f32 %v888_v63, %v795_v3 }
 0x1fe   :  { %801 = vmax.xlane.f32.xlu0 %v796_v5 }
 0x287   :  { %v800_v6 = vpop.xlane.xlu0 %799 }
 0x288   :  { %v803_v7 = vsub.f32 %v793_v1, %v800_v6 }
 0x28a   :  { %v805_v8 = vmul.f32 1.442695, %v803_v7 }
 0x28b   :  { %v802_v9 = vpop.xlane.xlu0 %801 }
 0x28c   :  { %1059 = vpow2.f32 %v805_v8  ;;  %v804_v10 = vsub.f32 %v796_v5, %v802_v9 }
 0x28e   :  { %v807_v11 = vmul.f32 1.442695, %v804_v10 }
 0x290   :  { %1061 = vpow2.f32 %v807_v11 }
 0x296   :  { %v1060_v12 = vpop.eup %1059 }
 0x297   :  { %809 = vadd.xlane.f32.xlu1 %v1060_v12 }
 0x29a   :  { %v1062_v13 = vpop.eup %1061 }
 0x29b   :  { %811 = vadd.xlane.f32.xlu1 %v1062_v13 }
 0x324   :  { %v810_v14 = vpop.xlane.xlu1 %809 }
 0x325   :  { %1063 = vrcp.f32 %v810_v14 }
 0x328   :  { %v812_v15 = vpop.xlane.xlu1 %811 }
 0x329   :  { %1065 = vrcp.f32 %v812_v15 }
 0x32f   :  { %v1064_v16 = vpop.eup %1063 }
 0x330   :  { %v814_v17 = vmul.f32 %v1064_v16, %v1060_v12 }
 0x332   :  { %817 = vst [vmem:[%s1362_s5] sm:$0xff] %v814_v17 }
 0x333   :  { %v1066_v18 = vpop.eup %1065 }
 0x334   :  { %v816_v19 = vmul.f32 %v1066_v18, %v1062_v13 }
 0x336   :  { %818 = vst [vmem:[%s1362_s5 + $0x8] sm:$0xff] %v816_v19 }

</bundles_post_ra>
